<compile_context>
chip_gen: v7x
topology: tpu7x:2x2x1
jax: 0.10.0
libtpu: 0.0.40
codegen_flags: <defaults>
</compile_context>

<pallas_src>
import functools

import jax
import jax.numpy as jnp
from jax import lax
from jax.experimental import pallas as pl
from jax.experimental.pallas import tpu as pltpu


def _sharpness_kernel(W, factor_ref, x_ref, mask_ref, o_ref):
    """One block of packed planes.

    x_ref / o_ref : (Pb, H*W)  — each sublane row is one flattened (H, W) plane
    mask_ref      : (1,  H*W)  — 1.0 on interior pixels, 0.0 on borders
    factor_ref    : (1,)       — sharpness blend factor (scalar prefetch, SMEM)
    """
    HW = x_ref.shape[-1]
    x = x_ref[...].astype(jnp.float32)
    mask = mask_ref[...]  # (1, HW), broadcasts over the plane (sublane) axis

    # Separable 3x3 box sum via 4 lane rolls (XLU).  Wrap-around of the rolls
    # stays inside the same plane and only affects border pixels, which are
    # masked back to the original image below.
    left = pltpu.roll(x, shift=1, axis=1)            # value of left neighbor
    right = pltpu.roll(x, shift=HW - 1, axis=1)      # value of right neighbor
    rowsum = left + x + right
    up = pltpu.roll(rowsum, shift=W, axis=1)         # row above
    down = pltpu.roll(rowsum, shift=HW - W, axis=1)  # row below
    colsum = up + rowsum + down                      # plain 3x3 sum (all ones)

    # blur = (8 neighbors + 5*center)/13 = colsum/13 + (4/13)*center
    blur = colsum * (1.0 / 13.0) + x * (4.0 / 13.0)

    # out = factor*x + (1-factor)*where(interior, blur, x)
    #     = x + (1-factor) * mask * (blur - x)
    factor = factor_ref[0]
    out = x + (1.0 - factor) * (mask * (blur - x))
    o_ref[...] = jnp.clip(out, 0.0, 1.0).astype(o_ref.dtype)


def _pick_block_planes(P, HW, itemsize, target_bytes=1 << 20):
    """Planes per grid step: ~1 MiB blocks, sublane-legal (mult of 8 or full)."""
    plane_bytes = HW * itemsize
    if P <= 8 or P * plane_bytes <= target_bytes:
        return int(P)
    pb = max(8, (target_bytes // plane_bytes) // 8 * 8)
    return int(min(pb, P))


@jax.jit
def adjust_sharpness_pallas(image, factor):
    """image: (N, C, H, W) float in [0, 1]; factor: scalar sharpness factor."""
    if not jnp.issubdtype(image.dtype, jnp.floating):
        # TODO(synk): uint8 path (bound=255, integer rounding) not implemented.
        raise NotImplementedError("adjust_sharpness_pallas expects a float image in [0, 1]")

    N, C, H, W = image.shape
    P = N * C
    HW = H * W
    itemsize = jnp.dtype(image.dtype).itemsize

    # Free row-major reshape: lane axis becomes the whole flattened plane.
    x2d = image.reshape(P, HW)
    factor_arr = jnp.asarray(factor, jnp.float32).reshape((1,))

    # Interior mask (borders keep the original pixel), built once outside the
    # kernel.  NOTE: if H < 3 or W < 3 the mask is all zeros and the op reduces
    # to clip(x) — matches the previous behavior for this edge case.
    hh = jnp.arange(H)
    ww = jnp.arange(W)
    interior = (((hh >= 1) & (hh <= H - 2))[:, None]
                & ((ww >= 1) & (ww <= W - 2))[None, :])
    mask = interior.astype(jnp.float32).reshape(1, HW)

    Pb = _pick_block_planes(P, HW, itemsize)
    grid = (pl.cdiv(P, Pb),)

    # VMEM budget: in/out double-buffered blocks + intermediates; generous but
    # capped so it stays valid on v7x (64 MiB physical VMEM).
    block_bytes = Pb * HW * itemsize
    vmem_limit = int(min(max(32 * 1024 * 1024, 16 * block_bytes), 100 * 1024 * 1024))

    grid_spec = pltpu.PrefetchScalarGridSpec(
        num_scalar_prefetch=1,
        grid=grid,
        in_specs=[
            pl.BlockSpec((Pb, HW), lambda i, fac: (i, 0)),
            pl.BlockSpec((1, HW), lambda i, fac: (0, 0)),
        ],
        out_specs=pl.BlockSpec((Pb, HW), lambda i, fac: (i, 0)),
    )

    out2d = pl.pallas_call(
        functools.partial(_sharpness_kernel, W),
        out_shape=jax.ShapeDtypeStruct((P, HW), image.dtype),
        grid_spec=grid_spec,
        compiler_params=pltpu.CompilerParams(
            dimension_semantics=("parallel",),
            vmem_limit_bytes=vmem_limit,
        ),
    )(factor_arr, x2d, mask)

    return out2d.reshape(N, C, H, W)


class Sharpness:
    """JAX/Pallas port of the PyTorch Sharpness augmentation module.

    All randomness stays on device (no host sync).  The original module
    mutates self.magnitude in place; we keep the port pure and re-draw the
    sign each call.
    """

    def __init__(self, p, magnitude, minus=True):
        self.p = p
        self.magnitude = magnitude
        self.minus = minus

    def __call__(self, image, key):
        k1, k2 = jax.random.split(key)
        flip = jnp.logical_and(self.minus, jax.random.uniform(k1) < 0.5)
        magnitude = jnp.where(flip, -self.magnitude, self.magnitude)
        factor = 1.0 + magnitude
        apply = jax.random.uniform(k2) < self.p
        return lax.cond(
            apply,
            lambda img: adjust_sharpness_pallas(img, factor),
            lambda img: img,
            image,
        )

    def __repr__(self):
        return "Sharpness(p={0}, magnitude={1})".format(self.p, self.magnitude)


# ----------------------------------------------------------------------------
# Pure-JAX reference mirroring torchvision adjust_sharpness (float path).
# ----------------------------------------------------------------------------
_W3 = [[1.0 / 13.0, 1.0 / 13.0, 1.0 / 13.0],
       [1.0 / 13.0, 5.0 / 13.0, 1.0 / 13.0],
       [1.0 / 13.0, 1.0 / 13.0, 1.0 / 13.0]]


def _ref_adjust_sharpness(img, factor):
    w = jnp.array(_W3, jnp.float32)
    N, C, H, W = img.shape
    acc = jnp.zeros((N, C, H - 2, W - 2), jnp.float32)
    for di in range(3):
        for dj in range(3):
            acc = acc + w[di, dj] * img[:, :, di:di + H - 2, dj:dj + W - 2]
    degenerate = img.at[:, :, 1:-1, 1:-1].set(acc.astype(img.dtype))
    return jnp.clip(factor * img + (1.0 - factor) * degenerate, 0.0, 1.0)


if __name__ == "__main__":
    key = jax.random.PRNGKey(0)
    k_img, k_img2, k_aug = jax.random.split(key, 3)

    # Small NCHW image batch, values in [0, 1] like a normalized image tensor.
    image = jax.random.uniform(k_img, (2, 4, 16, 16), dtype=jnp.float32)

    # Direct kernel checks against the pure-JAX reference for several factors.
    for factor in (1.5, 0.5, 1.9):
        out = jax.block_until_ready(adjust_sharpness_pallas(image, factor))
        ref = _ref_adjust_sharpness(image, factor)
        assert out.shape == image.shape and out.dtype == image.dtype
        assert jnp.allclose(out, ref, atol=1e-5, rtol=1e-5)

    # Second shape (different H, W; P < 8 path) to exercise block planning.
    image2 = jax.random.uniform(k_img2, (1, 3, 8, 160), dtype=jnp.float32)
    out2 = jax.block_until_ready(adjust_sharpness_pallas(image2, 1.25))
    ref2 = _ref_adjust_sharpness(image2, 1.25)
    assert jnp.allclose(out2, ref2, atol=1e-5, rtol=1e-5)

    # Exercise the augmentation wrapper (device-side randomness, no host sync),
    # then reproduce its random decisions to cross-check the result.
    aug = Sharpness(p=1.0, magnitude=0.5, minus=True)
    out = jax.block_until_ready(aug(image, k_aug))
    k1, _ = jax.random.split(k_aug)
    mag = jnp.where(jax.random.uniform(k1) < 0.5, -0.5, 0.5)
    ref = _ref_adjust_sharpness(image, 1.0 + mag)
    assert out.shape == image.shape and out.dtype == image.dtype
    assert jnp.allclose(out, ref, atol=1e-5, rtol=1e-5)

    print("KERNEL_OK")
</pallas_src>

<mosaic_0001>
module attributes {stable_mosaic.version = 11 : i64} {
  func.func @_sharpness_kernel(%arg0: i32, %arg1: memref<1xf32, #tpu.memory_space<smem>>, %arg2: memref<8x256xf32, #tpu.memory_space<vmem>>, %arg3: memref<1x256xf32, #tpu.memory_space<vmem>>, %arg4: memref<8x256xf32, #tpu.memory_space<vmem>>) attributes {dimension_semantics = [#tpu.dimension_semantics<parallel>], iteration_bounds = array<i64: 1>, scalar_prefetch = 1 : i64, scratch_operands = 0 : i64, tpu.core_type = #tpu.core_type<tc>, window_params = [{transform_indices = @transform_0, window_bounds = array<i64: 8, 256>}, {pipeline_mode = #tpu.pipeline_mode<synchronous>, transform_indices = @transform_1, window_bounds = array<i64: 1, 256>}, {transform_indices = @transform_2, window_bounds = array<i64: 8, 256>}]} {
    %c0 = arith.constant 0 : index
    %c0_0 = arith.constant 0 : index
    %0 = vector.load %arg2[%c0, %c0_0] : memref<8x256xf32, #tpu.memory_space<vmem>>, vector<8x256xf32>
    %c0_1 = arith.constant 0 : index
    %c0_2 = arith.constant 0 : index
    %1 = vector.load %arg3[%c0_1, %c0_2] : memref<1x256xf32, #tpu.memory_space<vmem>>, vector<1x256xf32>
    %c1_i32 = arith.constant 1 : i32
    %2 = tpu.dynamic_rotate %0 by %c1_i32 dim 1 : vector<8x256xf32>, i32 -> vector<8x256xf32>
    %c255_i32 = arith.constant 255 : i32
    %3 = tpu.dynamic_rotate %0 by %c255_i32 dim 1 : vector<8x256xf32>, i32 -> vector<8x256xf32>
    %4 = arith.addf %2, %0 : vector<8x256xf32>
    %5 = arith.addf %4, %3 : vector<8x256xf32>
    %c16_i32 = arith.constant 16 : i32
    %6 = tpu.dynamic_rotate %5 by %c16_i32 dim 1 : vector<8x256xf32>, i32 -> vector<8x256xf32>
    %c240_i32 = arith.constant 240 : i32
    %7 = tpu.dynamic_rotate %5 by %c240_i32 dim 1 : vector<8x256xf32>, i32 -> vector<8x256xf32>
    %8 = arith.addf %6, %5 : vector<8x256xf32>
    %9 = arith.addf %8, %7 : vector<8x256xf32>
    %cst = arith.constant 0.0769230798 : f32
    %10 = vector.broadcast %cst : f32 to vector<8x256xf32>
    %11 = arith.mulf %9, %10 : vector<8x256xf32>
    %cst_3 = arith.constant 0.307692319 : f32
    %12 = vector.broadcast %cst_3 : f32 to vector<8x256xf32>
    %13 = arith.mulf %0, %12 : vector<8x256xf32>
    %14 = arith.addf %11, %13 : vector<8x256xf32>
    %c0_4 = arith.constant 0 : index
    %15 = memref.load %arg1[%c0_4] : memref<1xf32, #tpu.memory_space<smem>>
    %cst_5 = arith.constant 1.000000e+00 : f32
    %16 = arith.subf %cst_5, %15 : f32
    %17 = arith.subf %14, %0 : vector<8x256xf32>
    %18 = vector.broadcast %1 : vector<1x256xf32> to vector<8x256xf32>
    %19 = arith.mulf %18, %17 : vector<8x256xf32>
    %20 = vector.broadcast %16 : f32 to vector<8x256xf32>
    %21 = arith.mulf %20, %19 : vector<8x256xf32>
    %22 = arith.addf %0, %21 : vector<8x256xf32>
    %cst_6 = arith.constant 0.000000e+00 : f32
    %cst_7 = arith.constant 1.000000e+00 : f32
    %23 = vector.broadcast %cst_6 : f32 to vector<8x256xf32>
    %24 = arith.maximumf %23, %22 : vector<8x256xf32>
    %25 = vector.broadcast %cst_7 : f32 to vector<8x256xf32>
    %26 = arith.minimumf %25, %24 : vector<8x256xf32>
    %c0_8 = arith.constant 0 : index
    %c0_9 = arith.constant 0 : index
    %27 = vector.load %arg4[%c0_8, %c0_9] : memref<8x256xf32, #tpu.memory_space<vmem>>, vector<8x256xf32>
    tpu.vector_store %arg4[%c0_8, %c0_9], %26 {strides = array<i32>} : memref<8x256xf32, #tpu.memory_space<vmem>>, vector<8x256xf32>,
    return
  }
  func.func @transform_0(%arg0: i32, %arg1: memref<1xf32, #tpu.memory_space<smem>>) -> (i32, i32) {
    %c0_i32 = arith.constant 0 : i32
    %c0_i32_0 = arith.constant 0 : i32
    return %arg0, %c0_i32 : i32, i32
  }
  func.func @transform_1(%arg0: i32, %arg1: memref<1xf32, #tpu.memory_space<smem>>) -> (i32, i32) {
    %c0_i32 = arith.constant 0 : i32
    %c0_i32_0 = arith.constant 0 : i32
    %c0_i32_1 = arith.constant 0 : i32
    return %c0_i32, %c0_i32_0 : i32, i32
  }
  func.func @transform_2(%arg0: i32, %arg1: memref<1xf32, #tpu.memory_space<smem>>) -> (i32, i32) {
    %c0_i32 = arith.constant 0 : i32
    %c0_i32_0 = arith.constant 0 : i32
    return %arg0, %c0_i32 : i32, i32
  }
}

</mosaic_0001>

<bundles_post_ra>
// kernel: adjust_sharpness_pallas.1
= control target key start
LH: loop header
LB: loop body
LE: loop exit
PB: predicated region body
PF: predicated region fallthrough
CT: control target
= control target key end

     0   :  { %s96_s14 = smov 127   ;;  %s97_s15 = smov 1   ;;  %v20_v2 = vlaneseq  ;;  %s146_s1 = inlined_call_operand.vmem [shape: f32[8,256], index: 1, kind: input, shape index: {}]   ;;  %s147_s2 = inlined_call_operand.vmem [shape: f32[1,256], index: 2, kind: input, shape index: {}]   ;;  %s148_s0 = inlined_call_operand.<no memory space> [shape: f32[1], index: 0, kind: input, shape index: {}]   ;;  %s149_s3 = inlined_call_operand.vmem [shape: f32[8,256], index: 3, kind: output, shape index: {}]  }
   0x1   :  { %v123_v0 = vld [vmem:[%s146_s1] sm:$0xff]  ;;  %v14_v1 = vld [vmem:[%s146_s1 + $0x8] sm:$0xff]  ;;  %s98_s1 = smov 16   ;;  %s99_s18 = smov 112  }
   0x2   :  { %25 = vrot.lane.b32.xlu1 %v123_v0, %s96_s14  ;;  %16 = vrot.lane.b32.xlu0 %v123_v0, %s97_s15  ;;  %v21_v3 = vand.u32 127, %v20_v2  ;;  %v66_v20 = vshrl.u32 %v20_v2, 7  ;;  %v57_v25 = vmul.f32 0.30769232, %v14_v1  ;;  %v56_v32 = vmul.f32 0.30769232, %v123_v0 }
   0x3   :  { %v15_v33 = vld [vmem:[%s147_s2] sm:$0x3]  ;;  %s61_s23 = ssub.f32 1.0, %s148_s0 }
   0x4   :  { %vm22_vm0 = vcmp.lt.s32.totalorder %v21_v3, 1  ;;  %vm29_vm1 = vcmp.lt.s32.totalorder %v21_v3, 127  ;;  %vm40_vm2 = vcmp.lt.s32.totalorder %v21_v3, 16  ;;  %vm47_vm3 = vcmp.lt.s32.totalorder %v21_v3, 112 }
   0x5   :  { %v67_v26 = vsub.s32 0, %v66_v20  ;;  %v71_v29 = vsub.s32 1, %v66_v20  ;;  %v77_v42 = vstv %s61_s23 }
   0x6   :  { %27 = vrot.lane.b32.xlu1 %v14_v1, %s96_s14  ;;  %18 = vrot.lane.b32.xlu0 %v14_v1, %s97_s15 }
   0x7   :  { %v68_v36 = vrot.slane %v15_v33, %v67_v26  ;;  %v72_v37 = vrot.slane %v15_v33, %v71_v29 }
  0x74   :  { %v26_v4 = vpop.permute.xlu1 %25  ;;  %v17_v5 = vpop.permute.xlu0 %16 }
  0x78   :  { %v28_v6 = vpop.permute.xlu1 %27  ;;  %v19_v7 = vpop.permute.xlu0 %18 }
  0x79   :  { %v23_v8 = vsel %vm22_vm0, %v17_v5, %v19_v7  ;;  %v24_v9 = vsel %vm22_vm0, %v19_v7, %v17_v5  ;;  %v30_v12 = vsel %vm29_vm1, %v26_v4, %v28_v6  ;;  %v31_v13 = vsel %vm29_vm1, %v28_v6, %v26_v4 }
  0x7a   :  { %v32_v10 = vadd.f32 %v24_v9, %v123_v0  ;;  %v33_v11 = vadd.f32 %v23_v8, %v14_v1 }
  0x7c   :  { %v34_v14 = vadd.f32 %v32_v10, %v30_v12  ;;  %v35_v15 = vadd.f32 %v33_v11, %v31_v13 }
  0x7e   :  { %36 = vrot.lane.b32.xlu0 %v34_v14, %s98_s1  ;;  %38 = vrot.lane.b32.xlu1 %v35_v15, %s98_s1 }
  0x82   :  { %43 = vrot.lane.b32.xlu0 %v34_v14, %s99_s18  ;;  %45 = vrot.lane.b32.xlu1 %v35_v15, %s99_s18 }
  0xf0   :  { %v37_v16 = vpop.permute.xlu0 %36  ;;  %v39_v17 = vpop.permute.xlu1 %38 }
  0xf1   :  { %v41_v18 = vsel %vm40_vm2, %v37_v16, %v39_v17  ;;  %v42_v19 = vsel %vm40_vm2, %v39_v17, %v37_v16 }
  0xf2   :  { %v50_v21 = vadd.f32 %v42_v19, %v34_v14  ;;  %v51_v22 = vadd.f32 %v41_v18, %v35_v15 }
  0xf4   :  { %v44_v23 = vpop.permute.xlu0 %43  ;;  %v46_v24 = vpop.permute.xlu1 %45 }
  0xf5   :  { %v48_v27 = vsel %vm47_vm3, %v44_v23, %v46_v24  ;;  %v49_v28 = vsel %vm47_vm3, %v46_v24, %v44_v23 }
  0xf6   :  { %v52_v30 = vadd.f32 %v50_v21, %v48_v27  ;;  %v53_v31 = vadd.f32 %v51_v22, %v49_v28 }
  0xf8   :  { %v54_v34 = vmul.f32 0.07692308, %v52_v30  ;;  %v55_v35 = vmul.f32 0.07692308, %v53_v31 }
  0xfa   :  { %v58_v38 = vadd.f32 %v56_v32, %v54_v34  ;;  %v59_v39 = vadd.f32 %v57_v25, %v55_v35 }
  0xfc   :  { %v62_v40 = vsub.f32 %v58_v38, %v123_v0  ;;  %v63_v41 = vsub.f32 %v59_v39, %v14_v1 }
  0xfe   :  { %v75_v43 = vmul.f32 %v68_v36, %v62_v40  ;;  %v76_v44 = vmul.f32 %v72_v37, %v63_v41 }
 0x100   :  { %v78_v45 = vmul.f32 %v77_v42, %v75_v43  ;;  %v79_v46 = vmul.f32 %v77_v42, %v76_v44 }
 0x102   :  { %v80_v47 = vadd.f32 %v78_v45, %v123_v0  ;;  %v81_v48 = vadd.f32 %v79_v46, %v14_v1 }
 0x104   :  { %v82_v49 = vmax.f32 %v80_v47, 0.0  ;;  %v83_v50 = vmax.f32 %v81_v48, 0.0 }
 0x106   :  { %v84_v51 = vmin.f32 %v82_v49, 1.0  ;;  %v85_v52 = vmin.f32 %v83_v50, 1.0 }
 0x108   :  { %86 = vst [vmem:[%s149_s3] sm:$0xff] %v84_v51  ;;  %87 = vst [vmem:[%s149_s3 + $0x8] sm:$0xff] %v85_v52 }

</bundles_post_ra>
